<compile_context>
chip_gen: v6e
topology: v6e:2x2x1
jax: 0.10.0
libtpu: 0.0.40
codegen_flags: <defaults>
</compile_context>

<pallas_src>
import jax
import jax.numpy as jnp
from jax.experimental import pallas as pl
from jax.experimental.pallas import tpu as pltpu

IN_FEATURES = 64
OUT_FEATURES = 10
PADDED_OUT = 128            # lane-aligned weight/bias width for the MXU matmul
DEFAULT_BLOCK_B = 32768     # batch tile (multiple of 8); ~18.5 MiB double-buffered
SMALL_BATCH = 1024          # below this, plain XLA beats pallas_call launch cost


def linear_kernel(x_ref, w_ref, b_ref, o_ref):
    # x_ref: [TB, 64] f32, w_ref: [64, 128] f32 (cols 10..127 are zero),
    # b_ref: [1, 128] f32, o_ref: [TB, 10]
    acc = jnp.dot(x_ref[...], w_ref[...], preferred_element_type=jnp.float32)
    o_ref[...] = (acc[:, :OUT_FEATURES] + b_ref[:, :OUT_FEATURES]).astype(o_ref.dtype)


def prepare_params(weight, bias):
    """One-time prep: PyTorch layout [10, 64] / [10] -> padded [64, 128] / [1, 128]."""
    w_t = weight.T.astype(jnp.float32)                                  # [64, 10]
    w_pad = jnp.zeros((IN_FEATURES, PADDED_OUT), dtype=jnp.float32)
    w_pad = w_pad.at[:, :OUT_FEATURES].set(w_t)
    b_pad = jnp.zeros((1, PADDED_OUT), dtype=jnp.float32)
    b_pad = b_pad.at[:, :OUT_FEATURES].set(bias.astype(jnp.float32))
    return w_pad, b_pad


def _round_up(x, m):
    return ((x + m - 1) // m) * m


def _pick_batch_tile(B, block_b):
    if B > block_b:
        return block_b
    if B > 2048:
        # Force >= 2 grid steps so the "parallel" batch axis can shard across
        # v7x's two TensorCores (harmless on single-TC v5e/v6e).
        return min(block_b, _round_up(-(-B // 2), 8))
    return B


def linear_classifier_forward(x, w_pad, b_pad, *, block_b=DEFAULT_BLOCK_B,
                              force_pallas=False):
    """x: [B, 64], w_pad: [64, 128], b_pad: [1, 128] -> out: [B, 10]."""
    B = x.shape[0]

    if B < SMALL_BATCH and not force_pallas:
        # Launch-overhead dominated regime: a fused XLA matmul is faster.
        return x @ w_pad[:, :OUT_FEATURES] + b_pad[:, :OUT_FEATURES]

    tb = _pick_batch_tile(B, block_b)
    grid = (pl.cdiv(B, tb),)

    itemsize = jnp.dtype(x.dtype).itemsize
    x_tile_bytes = tb * IN_FEATURES * itemsize
    out_tile_bytes = tb * OUT_FEATURES * itemsize
    param_bytes = (IN_FEATURES * PADDED_OUT + PADDED_OUT) * 4
    # Double-buffered tiles + params + headroom; cap below v7x's 64 MiB physical VMEM.
    vmem_limit = min(max(2 * (x_tile_bytes + out_tile_bytes) + 2 * param_bytes
                         + (2 << 20), 8 << 20), 48 << 20)

    cost = pl.CostEstimate(
        flops=2 * B * IN_FEATURES * PADDED_OUT,         # actually-issued MXU work
        transcendentals=0,
        bytes_accessed=(B * IN_FEATURES * itemsize       # read x
                        + IN_FEATURES * PADDED_OUT * 4   # read W (once)
                        + PADDED_OUT * 4                 # read bias
                        + B * OUT_FEATURES * itemsize),  # write slim output
    )

    return pl.pallas_call(
        linear_kernel,
        out_shape=jax.ShapeDtypeStruct((B, OUT_FEATURES), x.dtype),
        grid_spec=pl.GridSpec(
            grid=grid,
            in_specs=[
                pl.BlockSpec((tb, IN_FEATURES), lambda i: (i, 0)),
                pl.BlockSpec((IN_FEATURES, PADDED_OUT), lambda i: (0, 0)),
                pl.BlockSpec((1, PADDED_OUT), lambda i: (0, 0)),
            ],
            out_specs=pl.BlockSpec((tb, OUT_FEATURES), lambda i: (i, 0)),
        ),
        compiler_params=pltpu.CompilerParams(
            dimension_semantics=("parallel",),
            vmem_limit_bytes=vmem_limit,
        ),
        cost_estimate=cost,
    )(x, w_pad, b_pad)


if __name__ == "__main__":
    key = jax.random.PRNGKey(0)
    k_x, k_w, k_b, k_x2 = jax.random.split(key, 4)

    # Deterministic parameter init, mirroring nn.Linear's uniform(-1/sqrt(in), 1/sqrt(in)).
    bound = 1.0 / (IN_FEATURES ** 0.5)
    weight = jax.random.uniform(k_w, (OUT_FEATURES, IN_FEATURES),
                                minval=-bound, maxval=bound, dtype=jnp.float32)
    bias = jax.random.uniform(k_b, (OUT_FEATURES,),
                              minval=-bound, maxval=bound, dtype=jnp.float32)
    w_pad, b_pad = prepare_params(weight, bias)   # hoisted out of the per-call path

    # 1) Small-batch demo (forces the Pallas path so the kernel is exercised).
    B1 = 8
    x1 = jax.random.normal(k_x, (B1, IN_FEATURES), dtype=jnp.float32)
    out1 = jax.block_until_ready(linear_classifier_forward(x1, w_pad, b_pad,
                                                           force_pallas=True))
    ref1 = x1 @ weight.T + bias
    assert out1.shape == (B1, OUT_FEATURES)
    assert jnp.allclose(out1, ref1, atol=1e-5, rtol=1e-5), "mismatch vs reference (B=8)"

    # 2) Multi-step grid with a ragged last batch tile.
    B2 = 50
    x2 = jax.random.normal(k_x2, (B2, IN_FEATURES), dtype=jnp.float32)
    out2 = jax.block_until_ready(linear_classifier_forward(x2, w_pad, b_pad,
                                                           block_b=16,
                                                           force_pallas=True))
    ref2 = x2 @ weight.T + bias
    assert out2.shape == (B2, OUT_FEATURES)
    assert jnp.allclose(out2, ref2, atol=1e-5, rtol=1e-5), "mismatch vs reference (B=50)"

    print("KERNEL_OK")
</pallas_src>

<mosaic_0001>
module attributes {stable_mosaic.version = 11 : i64} {
  func.func @linear_kernel(%arg0: i32, %arg1: memref<8x64xf32, #tpu.memory_space<vmem>>, %arg2: memref<64x128xf32, #tpu.memory_space<vmem>>, %arg3: memref<1x128xf32, #tpu.memory_space<vmem>>, %arg4: memref<8x10xf32, #tpu.memory_space<vmem>>) attributes {dimension_semantics = [#tpu.dimension_semantics<parallel>], iteration_bounds = array<i64: 1>, scalar_prefetch = 0 : i64, scratch_operands = 0 : i64, tpu.core_type = #tpu.core_type<tc>, window_params = [{transform_indices = @transform_0, window_bounds = array<i64: 8, 64>}, {pipeline_mode = #tpu.pipeline_mode<synchronous>, transform_indices = @transform_1, window_bounds = array<i64: 64, 128>}, {pipeline_mode = #tpu.pipeline_mode<synchronous>, transform_indices = @transform_2, window_bounds = array<i64: 1, 128>}, {transform_indices = @transform_3, window_bounds = array<i64: 8, 10>}]} {
    %c0 = arith.constant 0 : index
    %c0_0 = arith.constant 0 : index
    %0 = vector.load %arg1[%c0, %c0_0] : memref<8x64xf32, #tpu.memory_space<vmem>>, vector<8x64xf32>
    %c0_1 = arith.constant 0 : index
    %c0_2 = arith.constant 0 : index
    %1 = vector.load %arg2[%c0_1, %c0_2] : memref<64x128xf32, #tpu.memory_space<vmem>>, vector<64x128xf32>
    %cst = arith.constant dense<0.000000e+00> : vector<8x128xf32>
    %2 = tpu.matmul %0, %1, %cst {dimension_numbers = #tpu.dot_dimension_numbers<[1], [0], [0], [1], [0, 0, 1, 1], [], []>} : vector<8x64xf32>, vector<64x128xf32>, vector<8x128xf32> -> vector<8x128xf32>
    %3 = vector.extract_strided_slice %2 {offsets = [0, 0], sizes = [8, 10], strides = [1, 1]} : vector<8x128xf32> to vector<8x10xf32>
    %c0_3 = arith.constant 0 : index
    %c0_4 = arith.constant 0 : index
    %4 = vector.load %arg3[%c0_3, %c0_4] : memref<1x128xf32, #tpu.memory_space<vmem>>, vector<1x10xf32>
    %5 = vector.broadcast %4 : vector<1x10xf32> to vector<8x10xf32>
    %6 = arith.addf %3, %5 : vector<8x10xf32>
    %c0_5 = arith.constant 0 : index
    %c0_6 = arith.constant 0 : index
    %7 = vector.load %arg4[%c0_5, %c0_6] : memref<8x10xf32, #tpu.memory_space<vmem>>, vector<8x10xf32>
    tpu.vector_store %arg4[%c0_5, %c0_6], %6 {strides = array<i32>} : memref<8x10xf32, #tpu.memory_space<vmem>>, vector<8x10xf32>,
    return
  }
  func.func @transform_0(%arg0: i32) -> (i32, i32) {
    %c0_i32 = arith.constant 0 : i32
    %c0_i32_0 = arith.constant 0 : i32
    return %arg0, %c0_i32 : i32, i32
  }
  func.func @transform_1(%arg0: i32) -> (i32, i32) {
    %c0_i32 = arith.constant 0 : i32
    %c0_i32_0 = arith.constant 0 : i32
    %c0_i32_1 = arith.constant 0 : i32
    return %c0_i32, %c0_i32_0 : i32, i32
  }
  func.func @transform_2(%arg0: i32) -> (i32, i32) {
    %c0_i32 = arith.constant 0 : i32
    %c0_i32_0 = arith.constant 0 : i32
    %c0_i32_1 = arith.constant 0 : i32
    return %c0_i32, %c0_i32_0 : i32, i32
  }
  func.func @transform_3(%arg0: i32) -> (i32, i32) {
    %c0_i32 = arith.constant 0 : i32
    %c0_i32_0 = arith.constant 0 : i32
    return %arg0, %c0_i32 : i32, i32
  }
}

</mosaic_0001>

<bundles_post_ra>
// kernel: tpu_custom_call.1
= control target key start
LH: loop header
LB: loop body
LE: loop exit
PB: predicated region body
PF: predicated region fallthrough
CT: control target
= control target key end

     0   :  { %8 = vsyncpa [#allocation3], 0  ;;  %s292_s0 = inlined_call_operand.hbm [shape: f32[8,64], index: 0, kind: input, shape index: {}]   ;;  %s293_s1 = inlined_call_operand.hbm [shape: f32[64,128], index: 1, kind: input, shape index: {}]   ;;  %s294_s2 = inlined_call_operand.vmem [shape: f32[1,128], index: 2, kind: input, shape index: {}]   ;;  %s295_s3 = inlined_call_operand.hbm [shape: f32[8,10], index: 3, kind: output, shape index: {}]  }
   0x1   :  { %9 = vsyncpa [#allocation6], 0 }
   0x2   :  { %10 = vsyncpa [#allocation4], 0  ;;  %s253_s12 = smov [#allocation2]   ;;  %s254_s14 = smov [#allocation5]  }
   0x3   :  { %s17_s13 = sshll.u32 %s253_s12, 4  ;;  %s26_s15 = sshll.u32 %s254_s14, 4  ;;  %s18_s13 = int_to_ptr.vmem [resolvable:$true] %s17_s13  ;;  %s27_s15 = int_to_ptr.vmem [resolvable:$true] %s26_s15 }
   0x4   :  { %s195_s16 = scalar_lea.vmem %s18_s13, 128  ;;  %p200_p1 = scmp.lt.s32.totalorder %s18_s13, %s18_s13 }
   0x5   :  { %p196_p0 = scmp.ne.s32.totalorder %s18_s13, %s195_s16  ;;  %p201_p2 = scmp.lt.s32.totalorder %s195_s16, %s195_s16 }
   0x7   :  { %p202_p3 = por %p201_p2, %p200_p1 }
   0x9   :  { %p203_p4 = pnand %p202_p3, %p196_p0 }
   0xb   :  { %206 = shalt.err (!%p203_p4)
}
   0xc   :  { %20 = dma.hbm_to_vmem [thread:$0]  %s292_s0, 128, %s18_s13, [#allocation3]  }
   0xd   :  { %s215_s19 = scalar_lea.vmem %s27_s15, 1024  ;;  %p220_p6 = scmp.lt.s32.totalorder %s27_s15, %s27_s15 }
   0xe   :  { %p216_p5 = scmp.ne.s32.totalorder %s27_s15, %s215_s19  ;;  %p221_p7 = scmp.lt.s32.totalorder %s215_s19, %s215_s19 }
  0x10   :  { %p222_p8 = por %p221_p7, %p220_p6 }
  0x12   :  { %p223_p9 = pnand %p222_p8, %p216_p5 }
  0x14   :  { %226 = shalt.err (!%p223_p9)
}
  0x15   :  { %s255_s20 = smov 128   ;;  %s256_s21 = smov 8  }
  0x16   :  { %32 = dma.hbm_to_vmem [thread:$0]  %s293_s1, 1024, %s27_s15, [#allocation6], %s255_s20, %s255_s20, %s256_s21  }
  0x17   :  { %247 = dma.done.wait [#allocation3], 128  }
  0x18   :  { %248 = vsyncadd [#allocation3], 4294967168 }
  0x19   :  { %249 = dma.done.wait [#allocation6], 1024  }
  0x1a   :  { %250 = vsyncadd [#allocation6], 4294966272  ;;  %v257_v0 = vmov 0.0   ;;  %vm258_vm0 = vmmov 0   ;;  %v49_v1 = vld [vmem:[#allocation5 + $0x38] sm:$0xff]  ;;  %v48_v2 = vld [vmem:[#allocation5 + $0x30] sm:$0xff] }
  0x1b   :  { %161 = vmatprep.subr.mxu0 %v257_v0  ;;  %177 = vmatprep.mubr.msk.f32.mxu0 %vm258_vm0, %v257_v0  ;;  %v47_v3 = vld [vmem:[#allocation5 + $0x28] sm:$0xff]  ;;  %v46_v4 = vld [vmem:[#allocation5 + $0x20] sm:$0xff]  ;;  %v45_v5 = vld [vmem:[#allocation5 + $0x18] sm:$0xff]  ;;  %vm50_vm1 = vcmask 523264   ;;  %s259_s24 = smov [#allocation7]   ;;  %vm132_vm2 = vcmask 80896  }
  0x1c   :  { %162 = vmatpush3.msra.mxu0 %v49_v1  ;;  %v44_v6 = vld [vmem:[#allocation5 + $0x10] sm:$0xff]  ;;  %v43_v7 = vld [vmem:[#allocation5 + $0x8] sm:$0xff]  ;;  %v42_v8 = vld [vmem:[#allocation5] sm:$0xff]  ;;  %s140_s25 = sshll.u32 %s259_s24, 4  ;;  %s141_s25 = int_to_ptr.vmem [resolvable:$true] %s140_s25 }
  0x1d   :  { %163 = vmatprep.subr.mxu0 %v257_v0  ;;  %v41_v9 = vld [vmem:[#allocation2] sm:$0xff]  ;;  %s227_s26 = scalar_lea.vmem %s141_s25, 128  ;;  %p232_p11 = scmp.lt.s32.totalorder %s141_s25, %s141_s25 }
  0x1e   :  { %164 = vmatpush3.msra.mxu0 %v48_v2  ;;  %v151_v10 = vld [vmem:[%s294_s2] ss:$0 sm:$0xff]  ;;  %p228_p10 = scmp.ne.s32.totalorder %s141_s25, %s227_s26  ;;  %p233_p12 = scmp.lt.s32.totalorder %s227_s26, %s227_s26 }
  0x1f   :  { %165 = vmatprep.subr.mxu0 %v257_v0 }
  0x20   :  { %166 = vmatpush3.msra.mxu0 %v47_v3  ;;  %p234_p13 = por %p233_p12, %p232_p11 }
  0x21   :  { %167 = vmatprep.subr.mxu0 %v257_v0 }
  0x22   :  { %168 = vmatpush3.msra.mxu0 %v46_v4  ;;  %p235_p0 = pnand %p234_p13, %p228_p10 }
  0x23   :  { %169 = vmatprep.subr.mxu0 %v257_v0 }
  0x24   :  { %170 = vmatpush3.msra.mxu0 %v45_v5 }
  0x25   :  { %171 = vmatprep.subr.mxu0 %v257_v0 }
  0x26   :  { %172 = vmatpush3.msra.mxu0 %v44_v6 }
  0x27   :  { %173 = vmatprep.subr.mxu0 %v257_v0 }
  0x28   :  { %174 = vmatpush3.msra.mxu0 %v43_v7 }
  0x29   :  { %175 = vmatprep.subr.mxu0 %v257_v0 }
  0x2a   :  { %176 = vmatpush3.msra.mxu0 %v42_v8 }
  0x2b   :  { %178 = vmatmul.mubr.msk.f32.vlgmr.msra.gmra.mxu0 %vm50_vm1, %v41_v9 }
  0xeb   :  { %v120_v11 = vpop.f32.mrf.mxu0 }
  0xec   :  { %v131_v12 = vadd.f32 %v151_v10, %v120_v11 }
  0xed   :  { %v179_v13 = vpop.f32.mrf.mxu0 }
  0xee   :  { %133 = vst.msk [vmem:[#allocation7] sm:$0xff] %vm132_vm2, %v131_v12 }
  0xef   :  { %238 = shalt.err (!%p235_p0)
}
  0xf0   :  { %143 = dma.vmem_to_hbm [thread:$0]  %s141_s25, 128, %s295_s3, [#allocation4]  }
  0xf1   :  { %251 = dma.done.wait [#allocation4], 128  }
  0xf2   :  { %252 = vsyncadd [#allocation4], 4294967168 }
  0xf3   :  { %147 = vsyncpa [#allocation3], 1 }
  0xf4   :  { %148 = vsyncpa [#allocation6], 1 }
  0xf5   :  { %149 = vsyncpa [#allocation4], 1 }

</bundles_post_ra>
